<compile_context>
chip_gen: v5e
topology: v5e:2x2
jax: 0.10.0
libtpu: 0.0.40
codegen_flags: <defaults>
</compile_context>

<pallas_src>
import functools

import jax
import jax.numpy as jnp
from jax.experimental import pallas as pl
from jax.experimental.pallas import tpu as pltpu

# Real model dims (from the PyTorch module).
D_IN, D_H1, D_H2, D_OUT = 2, 30, 20, 1

H_P = 32            # padded hidden rows (sublane axis) for both hidden layers
VEC_COLS = 8        # packed small-vector tile: [w1c0, w1c1, b1, b2, w3, b3, 0, 0]
LANE = 128
MAX_TILE_B = 8192   # keeps double-buffered x/out blocks + intermediates well
                    # inside v5e's 16 MiB default scoped-VMEM budget
MIN_GRID_STEPS = 2  # >=2 batch steps so ("parallel",) can shard across v7x TCs
CHUNK_PREF = 256    # in-kernel strip-mine width (lanes)


def _round_up(n, m):
    return ((n + m - 1) // m) * m


def _cdiv(a, b):
    return (a + b - 1) // b


def _mlp_kernel(xt_ref, wvec_ref, w2t_ref, o_ref, *, chunk):
    # xt_ref:  (2, TILE_B)  batch-on-lanes input (x^T)
    # wvec_ref:(32, 8)      packed [W1 col0 | W1 col1 | b1 | b2 | w3 | b3@(0,5)]
    # w2t_ref: (32, 32)     zero-padded W2^T (out_features x in_features)
    # o_ref:   (1, TILE_B)  lane-dense sigmoid output
    w1c0 = wvec_ref[:, 0:1]          # (32, 1)
    w1c1 = wvec_ref[:, 1:2]          # (32, 1)
    b1 = wvec_ref[:, 2:3]            # (32, 1)
    b2 = wvec_ref[:, 3:4]            # (32, 1)
    w3 = wvec_ref[:, 4:5]            # (32, 1)
    b3 = wvec_ref[0:1, 5:6]          # (1, 1)
    w2t = w2t_ref[...]               # (32, 32)

    n_chunks = o_ref.shape[-1] // chunk
    for c in range(n_chunks):        # static strip-mine: all slices are constant
        sl = pl.ds(c * chunk, chunk)
        x0 = xt_ref[0:1, sl]         # (1, chunk)
        x1 = xt_ref[1:2, sl]         # (1, chunk)

        # Layer 1 (2 -> 30): K=2, so two VPU broadcast FMAs instead of the MXU.
        h1 = jnp.maximum(w1c0 * x0 + w1c1 * x1 + b1, 0.0)          # (32, chunk)

        # Layer 2 (30 -> 20), padded to 32x32: MXU dot, f32 accumulate.
        h2 = jnp.dot(w2t, h1, preferred_element_type=jnp.float32)  # (32, chunk)
        h2 = jnp.maximum(h2 + b2, 0.0)

        # Layer 3 (20 -> 1): VPU multiply + sublane (XLU) reduction.
        h3 = jnp.sum(w3 * h2, axis=0, keepdims=True) + b3          # (1, chunk)

        o_ref[:, sl] = jax.nn.sigmoid(h3)


def prepare_params(params):
    """One-time packing of weights/biases into two small resident TPU tiles.

    Zero padding is inert through Linear+ReLU chains, and the zero rows of the
    packed w3 column kill the padded h2 rows in the final reduction.
    """
    w1, b1, w2, b2, w3, b3 = params          # (in, out) layout, see init_params
    f32 = jnp.float32
    wvec = jnp.zeros((H_P, VEC_COLS), f32)
    wvec = wvec.at[:D_H1, 0].set(w1[0, :].astype(f32))   # W1^T column, feature 0
    wvec = wvec.at[:D_H1, 1].set(w1[1, :].astype(f32))   # W1^T column, feature 1
    wvec = wvec.at[:D_H1, 2].set(b1.astype(f32))
    wvec = wvec.at[:D_H2, 3].set(b2.astype(f32))
    wvec = wvec.at[:D_H2, 4].set(w3[:, 0].astype(f32))
    wvec = wvec.at[0, 5].set(b3.astype(f32)[0])
    w2t = jnp.zeros((H_P, H_P), f32).at[:D_H2, :D_H1].set(w2.T.astype(f32))
    return (wvec, w2t)


def _choose_tile_b(batch):
    b_lane = _round_up(max(batch, 1), LANE)
    tile = min(MAX_TILE_B, b_lane)
    if b_lane >= MIN_GRID_STEPS * LANE:
        # Keep at least MIN_GRID_STEPS batch steps (v7x megacore sharding;
        # harmless on single-TC v5e/v6e).
        tile = min(tile, _round_up(_cdiv(b_lane, MIN_GRID_STEPS), LANE))
    return tile


@jax.jit
def mlp_forward(x, padded_params):
    """x: (B, 2) float32 -> (B, 1) float32 (sigmoid probabilities)."""
    wvec, w2t = padded_params
    B = x.shape[0]
    tile_b = _choose_tile_b(B)
    b_pad = _round_up(B, tile_b)
    grid = (b_pad // tile_b,)
    chunk = next(c for c in (CHUNK_PREF, LANE) if tile_b % c == 0)

    # Batch-on-lanes, only the 2 real feature rows (8 B/sample extra traffic).
    xt = jnp.zeros((D_IN, b_pad), jnp.float32).at[:, :B].set(
        x.T.astype(jnp.float32))

    const = lambda i: (0, 0)  # resident params: block index never changes
    out = pl.pallas_call(
        functools.partial(_mlp_kernel, chunk=chunk),
        out_shape=jax.ShapeDtypeStruct((1, b_pad), jnp.float32),
        grid=grid,
        in_specs=[
            pl.BlockSpec((D_IN, tile_b), lambda i: (0, i)),  # x^T, tiled on batch
            pl.BlockSpec((H_P, VEC_COLS), const),            # packed vectors
            pl.BlockSpec((H_P, H_P), const),                 # W2^T
        ],
        out_specs=pl.BlockSpec((1, tile_b), lambda i: (0, i)),  # lane-dense out
        compiler_params=pltpu.CompilerParams(
            dimension_semantics=("parallel",),
            vmem_limit_bytes=32 << 20),
    )(xt, wvec, w2t)

    # (1, b_pad) -> (B, 1): slice + reshape only, no transpose relayout.
    return out[0, :B][:, None]


def init_params(key):
    """Deterministic init mirroring torch.nn.Linear's U(-1/sqrt(fan_in), ...)."""
    ks = jax.random.split(key, 6)

    def uni(k, shape, fan_in):
        bound = 1.0 / jnp.sqrt(fan_in)
        return jax.random.uniform(k, shape, jnp.float32, -bound, bound)

    # stored (in_features, out_features) so the reference is x @ W + b
    w1 = uni(ks[0], (D_IN, D_H1), D_IN)
    b1 = uni(ks[1], (D_H1,), D_IN)
    w2 = uni(ks[2], (D_H1, D_H2), D_H1)
    b2 = uni(ks[3], (D_H2,), D_H1)
    w3 = uni(ks[4], (D_H2, D_OUT), D_H2)
    b3 = uni(ks[5], (D_OUT,), D_H2)
    return (w1, b1, w2, b2, w3, b3)


def reference_forward(x, params):
    """Pure-JAX reference (matches PyTorch forward semantics)."""
    w1, b1, w2, b2, w3, b3 = params
    h = jnp.maximum(x @ w1 + b1, 0.0)
    h = jnp.maximum(h @ w2 + b2, 0.0)
    h = h @ w3 + b3
    return jax.nn.sigmoid(h)


if __name__ == "__main__":
    key = jax.random.PRNGKey(0)
    k_param, k_x1, k_x2 = jax.random.split(key, 3)
    params = init_params(k_param)
    padded_params = prepare_params(params)  # packed once, outside the hot path

    # Small batch of 2-feature inputs (Linear(2, 30) input).
    x_small = jax.random.normal(k_x1, (8, D_IN), dtype=jnp.float32)
    y_small = jax.block_until_ready(mlp_forward(x_small, padded_params))
    assert y_small.shape == (8, D_OUT)
    assert jnp.allclose(y_small, reference_forward(x_small, params),
                        atol=1e-5, rtol=1e-5)

    # Larger ragged batch: exercises the 2-step batch grid, in-kernel
    # strip-mining (3 x 256-lane chunks per step) and the padding slice.
    x_big = jax.random.normal(k_x2, (1500, D_IN), dtype=jnp.float32)
    y_big = jax.block_until_ready(mlp_forward(x_big, padded_params))
    assert y_big.shape == (1500, D_OUT)
    assert jnp.allclose(y_big, reference_forward(x_big, params),
                        atol=1e-5, rtol=1e-5)

    print("KERNEL_OK")
</pallas_src>

<mosaic_0001>
module attributes {stable_mosaic.version = 11 : i64} {
  func.func @_mlp_kernel(%arg0: i32, %arg1: memref<2x128xf32, #tpu.memory_space<vmem>>, %arg2: memref<32x8xf32, #tpu.memory_space<vmem>>, %arg3: memref<32x32xf32, #tpu.memory_space<vmem>>, %arg4: memref<1x128xf32, #tpu.memory_space<vmem>>) attributes {dimension_semantics = [#tpu.dimension_semantics<parallel>], iteration_bounds = array<i64: 1>, scalar_prefetch = 0 : i64, scratch_operands = 0 : i64, tpu.core_type = #tpu.core_type<tc>, window_params = [{transform_indices = @transform_0, window_bounds = array<i64: 2, 128>}, {pipeline_mode = #tpu.pipeline_mode<synchronous>, transform_indices = @transform_1, window_bounds = array<i64: 32, 8>}, {pipeline_mode = #tpu.pipeline_mode<synchronous>, transform_indices = @transform_2, window_bounds = array<i64: 32, 32>}, {transform_indices = @transform_3, window_bounds = array<i64: 1, 128>}]} {
    %c0 = arith.constant 0 : index
    %c0_0 = arith.constant 0 : index
    %0 = vector.load %arg2[%c0, %c0_0] : memref<32x8xf32, #tpu.memory_space<vmem>>, vector<32x1xf32>
    %c0_1 = arith.constant 0 : index
    %c1 = arith.constant 1 : index
    %1 = vector.load %arg2[%c0_1, %c1] : memref<32x8xf32, #tpu.memory_space<vmem>>, vector<32x1xf32>
    %c0_2 = arith.constant 0 : index
    %c2 = arith.constant 2 : index
    %2 = vector.load %arg2[%c0_2, %c2] : memref<32x8xf32, #tpu.memory_space<vmem>>, vector<32x1xf32>
    %c0_3 = arith.constant 0 : index
    %c3 = arith.constant 3 : index
    %3 = vector.load %arg2[%c0_3, %c3] : memref<32x8xf32, #tpu.memory_space<vmem>>, vector<32x1xf32>
    %c0_4 = arith.constant 0 : index
    %c4 = arith.constant 4 : index
    %4 = vector.load %arg2[%c0_4, %c4] : memref<32x8xf32, #tpu.memory_space<vmem>>, vector<32x1xf32>
    %c0_5 = arith.constant 0 : index
    %c5 = arith.constant 5 : index
    %5 = vector.load %arg2[%c0_5, %c5] : memref<32x8xf32, #tpu.memory_space<vmem>>, vector<1x1xf32>
    %c0_6 = arith.constant 0 : index
    %c0_7 = arith.constant 0 : index
    %6 = vector.load %arg3[%c0_6, %c0_7] : memref<32x32xf32, #tpu.memory_space<vmem>>, vector<32x32xf32>
    %c0_8 = arith.constant 0 : index
    %c0_9 = arith.constant 0 : index
    %7 = vector.load %arg1[%c0_8, %c0_9] : memref<2x128xf32, #tpu.memory_space<vmem>>, vector<1x128xf32>
    %c1_10 = arith.constant 1 : index
    %c0_11 = arith.constant 0 : index
    %8 = vector.load %arg1[%c1_10, %c0_11] : memref<2x128xf32, #tpu.memory_space<vmem>>, vector<1x128xf32>
    %9 = vector.broadcast %0 : vector<32x1xf32> to vector<32x128xf32>
    %10 = vector.broadcast %7 : vector<1x128xf32> to vector<32x128xf32>
    %11 = arith.mulf %9, %10 : vector<32x128xf32>
    %12 = vector.broadcast %1 : vector<32x1xf32> to vector<32x128xf32>
    %13 = vector.broadcast %8 : vector<1x128xf32> to vector<32x128xf32>
    %14 = arith.mulf %12, %13 : vector<32x128xf32>
    %15 = arith.addf %11, %14 : vector<32x128xf32>
    %16 = vector.broadcast %2 : vector<32x1xf32> to vector<32x128xf32>
    %17 = arith.addf %15, %16 : vector<32x128xf32>
    %cst = arith.constant 0.000000e+00 : f32
    %18 = vector.broadcast %cst : f32 to vector<32x128xf32>
    %19 = arith.maximumf %17, %18 : vector<32x128xf32>
    %cst_12 = arith.constant dense<0.000000e+00> : vector<32x128xf32>
    %20 = tpu.matmul %6, %19, %cst_12 {dimension_numbers = #tpu.dot_dimension_numbers<[1], [0], [0], [1], [0, 0, 1, 1], [], []>} : vector<32x32xf32>, vector<32x128xf32>, vector<32x128xf32> -> vector<32x128xf32>
    %21 = vector.broadcast %3 : vector<32x1xf32> to vector<32x128xf32>
    %22 = arith.addf %20, %21 : vector<32x128xf32>
    %cst_13 = arith.constant 0.000000e+00 : f32
    %23 = vector.broadcast %cst_13 : f32 to vector<32x128xf32>
    %24 = arith.maximumf %22, %23 : vector<32x128xf32>
    %25 = vector.broadcast %4 : vector<32x1xf32> to vector<32x128xf32>
    %26 = arith.mulf %25, %24 : vector<32x128xf32>
    %cst_14 = arith.constant dense<0.000000e+00> : vector<128xf32>
    %27 = vector.multi_reduction <add>, %26, %cst_14 [0] : vector<32x128xf32> to vector<128xf32>
    %28 = vector.shape_cast %27 : vector<128xf32> to vector<1x128xf32>
    %29 = vector.broadcast %5 : vector<1x1xf32> to vector<1x128xf32>
    %30 = arith.addf %28, %29 : vector<1x128xf32>
    %31 = arith.negf %30 : vector<1x128xf32>
    %32 = math.exp %31 : vector<1x128xf32>
    %cst_15 = arith.constant 1.000000e+00 : f32
    %33 = vector.broadcast %cst_15 : f32 to vector<1x128xf32>
    %34 = arith.addf %33, %32 : vector<1x128xf32>
    %35 = arith.divf %33, %34 : vector<1x128xf32>
    %c0_16 = arith.constant 0 : index
    %c0_17 = arith.constant 0 : index
    %36 = vector.load %arg4[%c0_16, %c0_17] : memref<1x128xf32, #tpu.memory_space<vmem>>, vector<1x128xf32>
    tpu.vector_store %arg4[%c0_16, %c0_17], %35 {strides = array<i32>} : memref<1x128xf32, #tpu.memory_space<vmem>>, vector<1x128xf32>,
    return
  }
  func.func @transform_0(%arg0: i32) -> (i32, i32) {
    %c0_i32 = arith.constant 0 : i32
    %c0_i32_0 = arith.constant 0 : i32
    return %c0_i32, %arg0 : i32, i32
  }
  func.func @transform_1(%arg0: i32) -> (i32, i32) {
    %c0_i32 = arith.constant 0 : i32
    %c0_i32_0 = arith.constant 0 : i32
    %c0_i32_1 = arith.constant 0 : i32
    return %c0_i32, %c0_i32_0 : i32, i32
  }
  func.func @transform_2(%arg0: i32) -> (i32, i32) {
    %c0_i32 = arith.constant 0 : i32
    %c0_i32_0 = arith.constant 0 : i32
    %c0_i32_1 = arith.constant 0 : i32
    return %c0_i32, %c0_i32_0 : i32, i32
  }
  func.func @transform_3(%arg0: i32) -> (i32, i32) {
    %c0_i32 = arith.constant 0 : i32
    %c0_i32_0 = arith.constant 0 : i32
    return %c0_i32, %arg0 : i32, i32
  }
}

</mosaic_0001>

<bundles_post_ra>
// kernel: mlp_forward.1
= control target key start
LH: loop header
LB: loop body
LE: loop exit
PB: predicated region body
PF: predicated region fallthrough
CT: control target
= control target key end

     0   :  { %v266_v0 = vmov 0   ;;  %v267_v4 = vmov 1   ;;  %v268_v6 = vmov 2   ;;  %v269_v7 = vmov 3   ;;  %s328_s1 = inlined_call_operand.vmem [shape: f32[32,8], index: 1, kind: input, shape index: {}]   ;;  %s329_s0 = inlined_call_operand.vmem [shape: f32[2,128], index: 0, kind: input, shape index: {}]   ;;  %s330_s2 = inlined_call_operand.vmem [shape: f32[32,32], index: 2, kind: input, shape index: {}]   ;;  %s331_s3 = inlined_call_operand.vmem [shape: f32[1,128], index: 3, kind: output, shape index: {}]  }
   0x1   :  { %245 = vset.pattern.permute.xlu1 %v266_v0  ;;  %243 = vset.pattern.permute.xlu0 %v266_v0  ;;  %v17_v1 = vld [vmem:[%s328_s1 + $0x18] sm:$0xff]  ;;  %v16_v2 = vld [vmem:[%s328_s1 + $0x10] sm:$0xff]  ;;  %v15_v3 = vld [vmem:[%s328_s1 + $0x8] sm:$0xff]  ;;  %v270_v12 = vmov 4   ;;  %v271_v20 = vmov 5   ;;  %vm115_vm0 = vcmask 261120  }
   0x2   :  { %42 = vperm.xlu0 %243, %v17_v1   ;;  %37 = vperm.xlu1 %245, %v16_v2   ;;  %v14_v5 = vld [vmem:[%s328_s1] sm:$0xff]  ;;  %v20_v46 = vld [vmem:[%s330_s2 + $0x8] sm:$0xff]  ;;  %v21_v47 = vld [vmem:[%s330_s2 + $0x10] sm:$0xff] }
   0x3   :  { %247 = vset.pattern.permute.xlu2 %v266_v0  ;;  %v261_v15 = vld [vmem:[%s329_s0 + $0x1] ss:$0 sm:$0xff]  ;;  %v260_v16 = vld [vmem:[%s329_s0] ss:$0 sm:$0xff]  ;;  %v22_v48 = vld [vmem:[%s330_s2 + $0x18] sm:$0xff] }
   0x4   :  { %32 = vperm.xlu2 %247, %v15_v3   ;;  %v18_v23 = vld [vmem:[%s328_s1] sm:$0x1] }
   0x5   :  { %v19_v45 = vld [vmem:[%s330_s2] sm:$0xff] }
   0xa   :  { %244 = vset.pattern.permute.xlu0 %v267_v4  ;;  %246 = vset.pattern.permute.xlu1 %v267_v4 }
   0xb   :  { %63 = vperm.xlu0 %244, %v17_v1   ;;  %59 = vperm.xlu1 %246, %v16_v2  }
   0xc   :  { %248 = vset.pattern.permute.xlu2 %v267_v4 }
   0xd   :  { %55 = vperm.xlu2 %248, %v15_v3  }
  0x13   :  { %249 = vset.pattern.permute.xlu1 %v268_v6  ;;  %51 = vperm.xlu0 %244, %v14_v5  }
  0x14   :  { %88 = vperm.xlu1 %249, %v17_v1  }
  0x15   :  { %250 = vset.pattern.permute.xlu2 %v266_v0 }
  0x16   :  { %27 = vperm.xlu2 %250, %v14_v5  }
  0x1b   :  { %252 = vset.pattern.permute.xlu0 %v268_v6 }
  0x1c   :  { %84 = vperm.xlu1 %249, %v16_v2   ;;  %76 = vperm.xlu0 %252, %v14_v5  }
  0x1e   :  { %251 = vset.pattern.permute.xlu2 %v268_v6 }
  0x1f   :  { %80 = vperm.xlu2 %251, %v15_v3  }
  0x24   :  { %253 = vset.pattern.permute.xlu1 %v269_v7  ;;  %255 = vset.pattern.permute.xlu0 %v270_v12 }
  0x25   :  { %100 = vperm.xlu1 %253, %v14_v5   ;;  %162 = vperm.xlu0 %255, %v14_v5  }
  0x27   :  { %254 = vset.pattern.permute.xlu2 %v269_v7 }
  0x28   :  { %104 = vperm.xlu2 %254, %v15_v3  }
  0x2d   :  { %108 = vperm.xlu1 %253, %v16_v2   ;;  %259 = vset.pattern.permute.xlu0 %v271_v20 }
  0x30   :  { %112 = vperm.xlu2 %254, %v17_v1  }
  0x35   :  { %256 = vset.pattern.permute.xlu1 %v270_v12 }
  0x36   :  { %166 = vperm.xlu1 %256, %v15_v3  }
  0x38   :  { %257 = vset.pattern.permute.xlu2 %v270_v12 }
  0x39   :  { %170 = vperm.xlu2 %257, %v16_v2  }
  0x3e   :  { %174 = vperm.xlu1 %256, %v17_v1  }
  0x41   :  { %258 = vset.pattern.permute.xlu2 %v271_v20 }
  0x42   :  { %192 = vperm.xlu2 %258, %v18_v23  }
  0x5e   :  { %v33_v8 = vpop.permute.xlu2 %32 }
  0x5f   :  { %v47_v24 = vmul.f32 %v260_v16, %v33_v8 }
  0x67   :  { %v56_v11 = vpop.permute.xlu2 %55 }
  0x68   :  { %v68_v25 = vmul.f32 %v261_v15, %v56_v11 }
  0x6a   :  { %v72_v30 = vadd.f32 %v68_v25, %v47_v24 }
  0x70   :  { %v28_v18 = vpop.permute.xlu2 %27 }
  0x71   :  { %v46_v31 = vmul.f32 %v260_v16, %v28_v18 }
  0x74   :  { %v38_v9 = vpop.permute.xlu1 %37  ;;  %v43_v10 = vpop.permute.xlu0 %42 }
  0x75   :  { %v49_v19 = vmul.f32 %v260_v16, %v43_v10  ;;  %v48_v32 = vmul.f32 %v260_v16, %v38_v9 }
  0x79   :  { %v81_v34 = vpop.permute.xlu2 %80 }
  0x7a   :  { %v92_v38 = vadd.f32 %v81_v34, %v72_v30 }
  0x7c   :  { %v96_v43 = vmax.f32 %v92_v38, 0.0 }
  0x7d   :  { %v64_v13 = vpop.permute.xlu0 %63  ;;  %v60_v14 = vpop.permute.xlu1 %59 }
  0x7e   :  { %v70_v17 = vmul.f32 %v261_v15, %v64_v13  ;;  %v69_v28 = vmul.f32 %v261_v15, %v60_v14 }
  0x80   :  { %v74_v22 = vadd.f32 %v70_v17, %v49_v19  ;;  %v73_v35 = vadd.f32 %v69_v28, %v48_v32 }
  0x82   :  { %v105_v50 = vpop.permute.xlu2 %104 }
  0x85   :  { %v52_v21 = vpop.permute.xlu0 %51 }
  0x86   :  { %v89_v26 = vpop.permute.xlu1 %88  ;;  %v67_v33 = vmul.f32 %v261_v15, %v52_v21 }
  0x87   :  { %v94_v27 = vadd.f32 %v89_v26, %v74_v22 }
  0x88   :  { %v71_v40 = vadd.f32 %v67_v33, %v46_v31 }
  0x89   :  { %v98_v29 = vmax.f32 %v94_v27, 0.0 }
  0x8a   :  { %v113_v54 = vpop.permute.xlu2 %112 }
  0x8b   :  { %140 = vmatpush.msra.mxu0 %v98_v29  ;;  %225 = vmatpush.msra.mxu1 %v98_v29 }
  0x8c   :  { %226 = vmatpush.msra.mxu2 %v98_v29  ;;  %227 = vmatpush.msra.mxu3 %v98_v29 }
  0x8e   :  { %v85_v36 = vpop.permute.xlu1 %84  ;;  %v77_v37 = vpop.permute.xlu0 %76 }
  0x8f   :  { %v93_v39 = vadd.f32 %v85_v36, %v73_v35  ;;  %v91_v42 = vadd.f32 %v77_v37, %v71_v40 }
  0x91   :  { %v97_v41 = vmax.f32 %v93_v39, 0.0  ;;  %v95_v44 = vmax.f32 %v91_v42, 0.0 }
  0x93   :  { %141 = vmatpush.msra.mxu0 %v97_v41  ;;  %228 = vmatpush.msra.mxu1 %v97_v41  ;;  %v171_v3 = vpop.permute.xlu2 %170 }
  0x94   :  { %229 = vmatpush.msra.mxu2 %v97_v41  ;;  %230 = vmatpush.msra.mxu3 %v97_v41 }
  0x95   :  { %142 = vmatpush.msra.mxu0 %v96_v43  ;;  %231 = vmatpush.msra.mxu1 %v96_v43 }
  0x96   :  { %232 = vmatpush.msra.mxu2 %v96_v43  ;;  %233 = vmatpush.msra.mxu3 %v96_v43 }
  0x97   :  { %143 = vmatpush.msra.mxu0 %v95_v44  ;;  %234 = vmatpush.msra.mxu1 %v95_v44  ;;  %v101_v49 = vpop.permute.xlu1 %100  ;;  %v163_v60 = vpop.permute.xlu0 %162 }
  0x98   :  { %235 = vmatpush.msra.mxu2 %v95_v44  ;;  %236 = vmatpush.msra.mxu3 %v95_v44 }
  0x99   :  { %220 = vmatmul.msk.f32.vlgmr.msra.gmra.mxu0 %vm115_vm0, %v19_v45  ;;  %221 = vmatmul.msk.f32.vlgmr.msra.gmra.mxu1 %vm115_vm0, %v20_v46 }
  0x9a   :  { %222 = vmatmul.msk.f32.vlgmr.msra.gmra.mxu2 %vm115_vm0, %v21_v47  ;;  %223 = vmatmul.msk.f32.vlgmr.msra.gmra.mxu3 %vm115_vm0, %v22_v48 }
  0x9c   :  { %v193_v17 = vpop.permute.xlu2 %192 }
  0x9f   :  { %v109_v51 = vpop.permute.xlu1 %108 }
  0xa8   :  { %v167_v57 = vpop.permute.xlu1 %166 }
  0xb0   :  { %v175_v8 = vpop.permute.xlu1 %174 }
 0x116   :  { %v145_v52 = vpop.f32.mrf.mxu0  ;;  %v148_v53 = vpop.f32.mrf.mxu1 }
 0x117   :  { %v146_v55 = vadd.f32 %v145_v52, %v101_v49  ;;  %v149_v56 = vadd.f32 %v148_v53, %v105_v50 }
 0x119   :  { %v157_v58 = vmax.f32 %v146_v55, 0.0  ;;  %v158_v59 = vmax.f32 %v149_v56, 0.0 }
 0x11b   :  { %v178_v63 = vmul.f32 %v167_v57, %v158_v59  ;;  %v177_v0 = vmul.f32 %v163_v60, %v157_v58 }
 0x11d   :  { %v151_v61 = vpop.f32.mrf.mxu2  ;;  %v154_v62 = vpop.f32.mrf.mxu3  ;;  %v181_v6 = vadd.f32 %v178_v63, %v177_v0 }
 0x11e   :  { %v152_v1 = vadd.f32 %v151_v61, %v109_v51  ;;  %v155_v2 = vadd.f32 %v154_v62, %v113_v54 }
 0x120   :  { %v159_v4 = vmax.f32 %v152_v1, 0.0  ;;  %v160_v5 = vmax.f32 %v155_v2, 0.0 }
 0x122   :  { %v179_v7 = vmul.f32 %v171_v3, %v159_v4  ;;  %v180_v9 = vmul.f32 %v175_v8, %v160_v5 }
 0x124   :  { %v182_v10 = vadd.f32 %v181_v6, %v179_v7 }
 0x126   :  { %v183_v11 = vadd.f32 %v182_v10, %v180_v9 }
 0x128   :  { %v184_v12 = vrot.slane %v183_v11, 4 }
 0x12a   :  { %v185_v13 = vadd.f32 %v184_v12, %v183_v11 }
 0x12c   :  { %v186_v14 = vrot.slane %v185_v13, 2 }
 0x12e   :  { %v187_v15 = vadd.f32 %v186_v14, %v185_v13 }
 0x130   :  { %v188_v16 = vrot.slane %v187_v15, 1 }
 0x132   :  { %v189_v18 = vadd.f32 %v188_v16, %v187_v15 }
 0x134   :  { %v195_v19 = vadd.f32 %v193_v17, %v189_v18 }
 0x136   :  { %v224_v20 = vmul.f32 -1.442695, %v195_v19 }
 0x138   :  { %262 = vpow2.f32 %v224_v20 }
 0x13e   :  { %v263_v21 = vpop.eup %262 }
 0x13f   :  { %v199_v22 = vadd.f32 1.0, %v263_v21 }
 0x141   :  { %264 = vrcp.f32 %v199_v22  ;;  %v211_v26 = vand.u32 2147483648, %v199_v22  ;;  %v209_v28 = vand.u32 2147483647, %v199_v22  ;;  %vm205_vm2 = vweird.f32 %v199_v22 }
 0x143   :  { %v212_v30 = vor.u32 1.1754944e-38, %v211_v26  ;;  %vm210_vm4 = vcmp.eq.f32.partialorder %v209_v28, 8.507059e+37 }
 0x147   :  { %v265_v23 = vpop.eup %264 }
 0x148   :  { %v201_v24 = vmul.f32 %v265_v23, %v199_v22  ;;  %vm206_vm1 = vweird.f32 %v265_v23 }
 0x149   :  { %vm207_vm3 = vmor %vm205_vm2, %vm206_vm1 }
 0x14a   :  { %v202_v25 = vsub.f32 1.0, %v201_v24 }
 0x14c   :  { %v203_v27 = vmul.f32 %v265_v23, %v202_v25 }
 0x14e   :  { %v204_v29 = vadd.f32 %v265_v23, %v203_v27 }
 0x150   :  { %v208_v31 = vsel %vm207_vm3, %v265_v23, %v204_v29 }
 0x151   :  { %v213_v32 = vsel %vm210_vm4, %v212_v30, %v208_v31 }
 0x152   :  { %215 = vst [vmem:[%s331_s3] sm:$0x1] %v213_v32 }

</bundles_post_ra>
